<compile_context>
chip_gen: v5e
topology: v5e:2x2
jax: 0.10.0
libtpu: 0.0.40
codegen_flags: <defaults>
</compile_context>

<pallas_src>
import functools

import jax
import jax.numpy as jnp
from jax.experimental import pallas as pl
from jax.experimental.pallas import tpu as pltpu


# ---------------------------------------------------------------------------
# Kernel: obs @ W1' + b1' -> tanh -> @ W2 + b2 -> tanh -> @ Wo + bo
# (standardizer already folded into W1'/b1' by the wrapper)
# ---------------------------------------------------------------------------
def _policy_kernel(obs_ref, w1_ref, b1_ref, w2_ref, b2_ref, wo_ref, bo_ref,
                   out_ref):
    h = jnp.dot(obs_ref[...], w1_ref[...],
                preferred_element_type=jnp.float32) + b1_ref[...]
    h = jnp.tanh(h)

    h = jnp.dot(h, w2_ref[...],
                preferred_element_type=jnp.float32) + b2_ref[...]
    h = jnp.tanh(h)

    out = jnp.dot(h, wo_ref[...],
                  preferred_element_type=jnp.float32) + bo_ref[...]
    out_ref[...] = out.astype(out_ref.dtype)


def _round_up(x, m):
    return ((x + m - 1) // m) * m


def loaded_gaussian_policy_forward(obs, mean, std, w1, b1, w2, b2, wo, bo,
                                   *, block_b=None):
    """Forward pass of LoadedGaussianPolicy as a single Pallas kernel.

    obs:  (B, D) f32
    mean/std: (1, D) standardizer stats
    w1: (D, H1), b1: (1, H1); w2: (H1, H2), b2: (1, H2); wo: (H2, A), bo: (1, A)

    block_b=None  -> no grid, full arrays resident in VMEM (small batches).
    block_b=int   -> batch-tiled grid (parallel over TensorCores on v7x),
                     weights held VMEM-resident across grid steps.
    """
    B, D = obs.shape
    H1 = w1.shape[1]
    H2 = w2.shape[1]
    A = wo.shape[1]

    # ---- Fold standardizer into layer 1 (done once, outside the kernel). ----
    inv_std = 1.0 / (std + 1e-6)                      # (1, D)
    w1f = w1 * inv_std.reshape(D, 1)                  # diag(inv_std) @ W1
    b1f = b1 - (mean * inv_std) @ w1                  # b1 - (mean*inv_std) @ W1

    # ---- Lane-dense output: pad action dim to a multiple of 128. ----
    A_pad = _round_up(A, 128)
    if A_pad != A:
        wo_p = jnp.pad(wo, ((0, 0), (0, A_pad - A)))
        bo_p = jnp.pad(bo, ((0, 0), (0, A_pad - A)))
    else:
        wo_p, bo_p = wo, bo

    if block_b is None:
        # Small-batch path: no grid, no pipelining — whole problem in VMEM.
        vmem = pltpu.MemorySpace.VMEM
        out = pl.pallas_call(
            _policy_kernel,
            out_shape=jax.ShapeDtypeStruct((B, A_pad), jnp.float32),
            in_specs=[pl.BlockSpec(memory_space=vmem)] * 7,
            out_specs=pl.BlockSpec(memory_space=vmem),
        )(obs, w1f, b1f, w2, b2, wo_p, bo_p)
        return out[:, :A]

    # ---- Batch-tiled path. ----
    block_b = _round_up(int(block_b), 8)              # sublane alignment
    nb = pl.cdiv(B, block_b)
    B_pad = nb * block_b
    obs_p = jnp.pad(obs, ((0, B_pad - B), (0, 0))) if B_pad != B else obs

    # Weights/biases: constant index_map -> stay resident in VMEM across steps.
    const2d = lambda i: (0, 0)
    out = pl.pallas_call(
        _policy_kernel,
        out_shape=jax.ShapeDtypeStruct((B_pad, A_pad), jnp.float32),
        grid=(nb,),
        in_specs=[
            pl.BlockSpec((block_b, D), lambda i: (i, 0)),   # obs: batch-blocked
            pl.BlockSpec((D, H1), const2d),
            pl.BlockSpec((1, H1), const2d),
            pl.BlockSpec((H1, H2), const2d),
            pl.BlockSpec((1, H2), const2d),
            pl.BlockSpec((H2, A_pad), const2d),
            pl.BlockSpec((1, A_pad), const2d),
        ],
        out_specs=pl.BlockSpec((block_b, A_pad), lambda i: (i, 0)),
        compiler_params=pltpu.CompilerParams(
            # Parallel batch axis: enables megacore sharding on v7x.
            dimension_semantics=("parallel",)),
    )(obs_p, w1f, b1f, w2, b2, wo_p, bo_p)
    return out[:B, :A]


def _reference_forward(obs, mean, std, w1, b1, w2, b2, wo, bo):
    h = (obs - mean) / (std + 1e-6)
    h = jnp.tanh(h @ w1 + b1)
    h = jnp.tanh(h @ w2 + b2)
    return h @ wo + bo


if __name__ == "__main__":
    # Shapes consistent with the module: obs dim 16, two hidden layers of 64,
    # action dim 8.  Small batch (8) exercises the no-grid VMEM-resident path;
    # a larger batch (512) exercises the batch-tiled parallel-grid path.
    D, H, A = 16, 64, 8

    key = jax.random.PRNGKey(0)
    ks = jax.random.split(key, 10)

    # Standardizer stats (mean_1_D / stdev derived from meansq in the module).
    obs_norm_mean = jax.random.normal(ks[1], (1, D), dtype=jnp.float32) * 0.1
    obs_norm_std = jnp.abs(jax.random.normal(ks[2], (1, D), dtype=jnp.float32)) + 0.5

    # Hidden / output affine layers, weights stored as (in, out).
    w1 = jax.random.normal(ks[3], (D, H), dtype=jnp.float32) * 0.1
    b1 = jax.random.normal(ks[4], (1, H), dtype=jnp.float32) * 0.01
    w2 = jax.random.normal(ks[5], (H, H), dtype=jnp.float32) * 0.1
    b2 = jax.random.normal(ks[6], (1, H), dtype=jnp.float32) * 0.01
    wo = jax.random.normal(ks[7], (H, A), dtype=jnp.float32) * 0.1
    bo = jax.random.normal(ks[8], (1, A), dtype=jnp.float32) * 0.01

    params = (obs_norm_mean, obs_norm_std, w1, b1, w2, b2, wo, bo)

    # --- Path 1: small batch, no grid (VMEM-resident). ---
    B_small = 8
    obs_small = jax.random.normal(ks[0], (B_small, D), dtype=jnp.float32)
    out_small = loaded_gaussian_policy_forward(obs_small, *params)
    out_small = jax.block_until_ready(out_small)
    ref_small = _reference_forward(obs_small, *params)
    assert out_small.shape == (B_small, A)
    assert jnp.allclose(out_small, ref_small, atol=1e-5, rtol=1e-5)

    # --- Path 2: larger batch, batch-tiled parallel grid. ---
    B_big = 512
    obs_big = jax.random.normal(ks[9], (B_big, D), dtype=jnp.float32)
    out_big = loaded_gaussian_policy_forward(obs_big, *params, block_b=256)
    out_big = jax.block_until_ready(out_big)
    ref_big = _reference_forward(obs_big, *params)
    assert out_big.shape == (B_big, A)
    assert jnp.allclose(out_big, ref_big, atol=1e-5, rtol=1e-5)

    print("KERNEL_OK")
</pallas_src>

<mosaic_0001>
module attributes {stable_mosaic.version = 11 : i64} {
  func.func @_policy_kernel(%arg0: memref<8x16xf32, #tpu.memory_space<vmem>>, %arg1: memref<16x64xf32, #tpu.memory_space<vmem>>, %arg2: memref<1x64xf32, #tpu.memory_space<vmem>>, %arg3: memref<64x64xf32, #tpu.memory_space<vmem>>, %arg4: memref<1x64xf32, #tpu.memory_space<vmem>>, %arg5: memref<64x128xf32, #tpu.memory_space<vmem>>, %arg6: memref<1x128xf32, #tpu.memory_space<vmem>>, %arg7: memref<8x128xf32, #tpu.memory_space<vmem>>) attributes {dimension_semantics = [], scalar_prefetch = 0 : i64, scratch_operands = 0 : i64, tpu.core_type = #tpu.core_type<tc>} {
    %c0 = arith.constant 0 : index
    %c0_0 = arith.constant 0 : index
    %0 = vector.load %arg0[%c0, %c0_0] : memref<8x16xf32, #tpu.memory_space<vmem>>, vector<8x16xf32>
    %c0_1 = arith.constant 0 : index
    %c0_2 = arith.constant 0 : index
    %1 = vector.load %arg1[%c0_1, %c0_2] : memref<16x64xf32, #tpu.memory_space<vmem>>, vector<16x64xf32>
    %cst = arith.constant dense<0.000000e+00> : vector<8x64xf32>
    %2 = tpu.matmul %0, %1, %cst {dimension_numbers = #tpu.dot_dimension_numbers<[1], [0], [0], [1], [0, 0, 1, 1], [], []>} : vector<8x16xf32>, vector<16x64xf32>, vector<8x64xf32> -> vector<8x64xf32>
    %c0_3 = arith.constant 0 : index
    %c0_4 = arith.constant 0 : index
    %3 = vector.load %arg2[%c0_3, %c0_4] : memref<1x64xf32, #tpu.memory_space<vmem>>, vector<1x64xf32>
    %4 = vector.broadcast %3 : vector<1x64xf32> to vector<8x64xf32>
    %5 = arith.addf %2, %4 : vector<8x64xf32>
    %6 = math.tanh %5 : vector<8x64xf32>
    %c0_5 = arith.constant 0 : index
    %c0_6 = arith.constant 0 : index
    %7 = vector.load %arg3[%c0_5, %c0_6] : memref<64x64xf32, #tpu.memory_space<vmem>>, vector<64x64xf32>
    %cst_7 = arith.constant dense<0.000000e+00> : vector<8x64xf32>
    %8 = tpu.matmul %6, %7, %cst_7 {dimension_numbers = #tpu.dot_dimension_numbers<[1], [0], [0], [1], [0, 0, 1, 1], [], []>} : vector<8x64xf32>, vector<64x64xf32>, vector<8x64xf32> -> vector<8x64xf32>
    %c0_8 = arith.constant 0 : index
    %c0_9 = arith.constant 0 : index
    %9 = vector.load %arg4[%c0_8, %c0_9] : memref<1x64xf32, #tpu.memory_space<vmem>>, vector<1x64xf32>
    %10 = vector.broadcast %9 : vector<1x64xf32> to vector<8x64xf32>
    %11 = arith.addf %8, %10 : vector<8x64xf32>
    %12 = math.tanh %11 : vector<8x64xf32>
    %c0_10 = arith.constant 0 : index
    %c0_11 = arith.constant 0 : index
    %13 = vector.load %arg5[%c0_10, %c0_11] : memref<64x128xf32, #tpu.memory_space<vmem>>, vector<64x128xf32>
    %cst_12 = arith.constant dense<0.000000e+00> : vector<8x128xf32>
    %14 = tpu.matmul %12, %13, %cst_12 {dimension_numbers = #tpu.dot_dimension_numbers<[1], [0], [0], [1], [0, 0, 1, 1], [], []>} : vector<8x64xf32>, vector<64x128xf32>, vector<8x128xf32> -> vector<8x128xf32>
    %c0_13 = arith.constant 0 : index
    %c0_14 = arith.constant 0 : index
    %15 = vector.load %arg6[%c0_13, %c0_14] : memref<1x128xf32, #tpu.memory_space<vmem>>, vector<1x128xf32>
    %16 = vector.broadcast %15 : vector<1x128xf32> to vector<8x128xf32>
    %17 = arith.addf %14, %16 : vector<8x128xf32>
    %c0_15 = arith.constant 0 : index
    %c0_16 = arith.constant 0 : index
    %18 = vector.load %arg7[%c0_15, %c0_16] : memref<8x128xf32, #tpu.memory_space<vmem>>, vector<8x128xf32>
    tpu.vector_store %arg7[%c0_15, %c0_16], %17 {strides = array<i32>} : memref<8x128xf32, #tpu.memory_space<vmem>>, vector<8x128xf32>,
    return
  }
}

</mosaic_0001>

<bundles_post_ra>
// kernel: tpu_custom_call.1
= control target key start
LH: loop header
LB: loop body
LE: loop exit
PB: predicated region body
PF: predicated region fallthrough
CT: control target
= control target key end

     0   :  { %12 = vsyncpa [#allocation3], 0  ;;  %s430_s0 = inlined_call_operand.hbm [shape: f32[8,16], index: 0, kind: input, shape index: {}]   ;;  %s431_s1 = inlined_call_operand.hbm [shape: f32[16,64], index: 1, kind: input, shape index: {}]   ;;  %s432_s2 = inlined_call_operand.vmem [shape: f32[1,64], index: 2, kind: input, shape index: {}]   ;;  %s433_s3 = inlined_call_operand.hbm [shape: f32[64,64], index: 3, kind: input, shape index: {}]   ;;  %s434_s4 = inlined_call_operand.vmem [shape: f32[1,64], index: 4, kind: input, shape index: {}]   ;;  %s435_s5 = inlined_call_operand.hbm [shape: f32[64,128], index: 5, kind: input, shape index: {}]   ;;  %s436_s6 = inlined_call_operand.vmem [shape: f32[1,128], index: 6, kind: input, shape index: {}]   ;;  %s437_s7 = inlined_call_operand.hbm [shape: f32[8,128], index: 7, kind: output, shape index: {}]  }
   0x1   :  { %13 = vsyncpa [#allocation6], 0 }
   0x2   :  { %14 = vsyncpa [#allocation9], 0  ;;  %s31_s26 = sshll.u32 %s431_s1, 4  ;;  %s32_s26 = int_to_ptr.hbm [resolvable:$true] %s31_s26 }
   0x3   :  { %15 = vsyncpa [#allocation4], 0  ;;  %s357_s27 = smov [#allocation5]   ;;  %s21_s8 = sshll.u32 %s430_s0, 4  ;;  %s22_s8 = int_to_ptr.hbm [resolvable:$true] %s21_s8 }
   0x4   :  { %s33_s28 = sshll.u32 %s357_s27, 4  ;;  %s358_s9 = smov 128   ;;  %s34_s28 = int_to_ptr.vmem [resolvable:$true] %s33_s28 }
   0x5   :  { %s359_s10 = smov 8   ;;  %s360_s11 = smov [#allocation2]  }
   0x6   :  { %39 = dma.hbm_to_vmem [thread:$0]  %s32_s26, 256, %s34_s28, [#allocation6], %s358_s9, %s358_s9, %s359_s10  }
   0x7   :  { %s23_s12 = sshll.u32 %s360_s11, 4  ;;  %s46_s15 = sshll.u32 %s433_s3, 4  ;;  %s24_s12 = int_to_ptr.vmem [resolvable:$true] %s23_s12  ;;  %s47_s15 = int_to_ptr.hbm [resolvable:$true] %s46_s15 }
   0x8   :  { %26 = dma.hbm_to_vmem [thread:$0]  %s22_s8, 128, %s24_s12, [#allocation3]  }
   0x9   :  { %s61_s17 = sshll.u32 %s435_s5, 4  ;;  %s361_s18 = smov [#allocation7]   ;;  %s62_s17 = int_to_ptr.hbm [resolvable:$true] %s61_s17 }
   0xa   :  { %s48_s19 = sshll.u32 %s361_s18, 4  ;;  %s362_s0 = smov [#allocation8]   ;;  %s49_s19 = int_to_ptr.vmem [resolvable:$true] %s48_s19 }
   0xb   :  { %54 = dma.hbm_to_vmem [thread:$0]  %s47_s15, 1024, %s49_s19, [#allocation6], %s358_s9, %s358_s9, %s359_s10  }
   0xc   :  { %s63_s20 = sshll.u32 %s362_s0, 4  ;;  %s64_s20 = int_to_ptr.vmem [resolvable:$true] %s63_s20 }
   0xd   :  { %69 = dma.hbm_to_vmem [thread:$0]  %s62_s17, 1024, %s64_s20, [#allocation9], %s358_s9, %s358_s9, %s359_s10  }
   0xe   :  { %349 = dma.done.wait [#allocation3], 128  }
   0xf   :  { %350 = vsyncadd [#allocation3], 4294967168 }
  0x10   :  { %351 = dma.done.wait [#allocation6], 1280  }
  0x11   :  { %352 = vsyncadd [#allocation6], 4294966016 }
  0x12   :  { %353 = dma.done.wait [#allocation9], 1024  }
  0x13   :  { %354 = vsyncadd [#allocation9], 4294966272  ;;  %v90_v0 = vld [vmem:[#allocation5 + $0x8] sm:$0xff]  ;;  %v89_v1 = vld [vmem:[#allocation5] sm:$0xff]  ;;  %vm95_vm0 = vcmask 130048   ;;  %vm132_vm1 = vcmask 523264  }
  0x14   :  { %113 = vmatpush.msra.mxu0 %v90_v0  ;;  %v88_v2 = vld [vmem:[#allocation2] sm:$0xff]  ;;  %v127_v3 = vld [vmem:[#allocation7 + $0x38] sm:$0xff]  ;;  %v126_v4 = vld [vmem:[#allocation7 + $0x30] sm:$0xff]  ;;  %s363_s24 = smov [#allocation10]   ;;  %s200_s28 = sshll.u32 %s437_s7, 4  ;;  %s201_s28 = int_to_ptr.hbm [resolvable:$true] %s200_s28 }
  0x15   :  { %144 = vmatpush.msra.mxu1 %v127_v3  ;;  %v125_v5 = vld [vmem:[#allocation7 + $0x28] sm:$0xff]  ;;  %v124_v6 = vld [vmem:[#allocation7 + $0x20] sm:$0xff]  ;;  %v123_v7 = vld [vmem:[#allocation7 + $0x18] sm:$0xff]  ;;  %s198_s25 = sshll.u32 %s363_s24, 4  ;;  %s199_s25 = int_to_ptr.vmem [resolvable:$true] %s198_s25 }
  0x16   :  { %114 = vmatpush.msra.mxu0 %v89_v1  ;;  %v122_v8 = vld [vmem:[#allocation7 + $0x10] sm:$0xff]  ;;  %v121_v9 = vld [vmem:[#allocation7 + $0x8] sm:$0xff]  ;;  %v120_v10 = vld [vmem:[#allocation7] sm:$0xff] }
  0x17   :  { %212 = vmatmul.msk.f32.vlgmr.msra.gmra.mxu0 %vm95_vm0, %v88_v2  ;;  %145 = vmatpush.msra.mxu1 %v126_v4  ;;  %v164_v11 = vld [vmem:[#allocation8 + $0x38] sm:$0xff]  ;;  %v163_v12 = vld [vmem:[#allocation8 + $0x30] sm:$0xff]  ;;  %v162_v13 = vld [vmem:[#allocation8 + $0x28] sm:$0xff] }
  0x18   :  { %180 = vmatpush.msra.mxu2 %v164_v11  ;;  %v222_v14 = vld [vmem:[%s432_s2] ss:$0 sm:$0xff]  ;;  %v161_v18 = vld [vmem:[#allocation8 + $0x20] sm:$0xff]  ;;  %v160_v19 = vld [vmem:[#allocation8 + $0x18] sm:$0xff] }
  0x19   :  { %146 = vmatpush.msra.mxu1 %v125_v5  ;;  %v159_v20 = vld [vmem:[#allocation8 + $0x10] sm:$0xff]  ;;  %v158_v21 = vld [vmem:[#allocation8 + $0x8] sm:$0xff]  ;;  %v157_v22 = vld [vmem:[#allocation8] sm:$0xff] }
  0x1a   :  { %181 = vmatpush.msra.mxu2 %v163_v12  ;;  %v223_v23 = vld [vmem:[%s434_s4] ss:$0 sm:$0xff] }
  0x1b   :  { %147 = vmatpush.msra.mxu1 %v124_v6  ;;  %v224_v27 = vld [vmem:[%s436_s6] ss:$0 sm:$0xff] }
  0x1c   :  { %182 = vmatpush.msra.mxu2 %v162_v13 }
  0x1d   :  { %148 = vmatpush.msra.mxu1 %v123_v7 }
  0x1e   :  { %183 = vmatpush.msra.mxu2 %v161_v18 }
  0x1f   :  { %149 = vmatpush.msra.mxu1 %v122_v8 }
  0x20   :  { %184 = vmatpush.msra.mxu2 %v160_v19 }
  0x21   :  { %150 = vmatpush.msra.mxu1 %v121_v9 }
  0x22   :  { %185 = vmatpush.msra.mxu2 %v159_v20 }
  0x23   :  { %151 = vmatpush.msra.mxu1 %v120_v10 }
  0x24   :  { %186 = vmatpush.msra.mxu2 %v158_v21 }
  0x26   :  { %187 = vmatpush.msra.mxu2 %v157_v22 }
  0x94   :  { %v116_v15 = vpop.f32.mrf.mxu0 }
  0x95   :  { %v117_v16 = vadd.f32 %v222_v14, %v116_v15 }
  0x97   :  { %225 = vtanh.f32 %v117_v16 }
  0x9d   :  { %v226_v17 = vpop.eup %225 }
  0x9e   :  { %213 = vmatmul.msk.f32.vlgmr.msra.gmra.mxu1 %vm132_vm1, %v226_v17 }
 0x11b   :  { %v153_v24 = vpop.f32.mrf.mxu1 }
 0x11c   :  { %v154_v25 = vadd.f32 %v223_v23, %v153_v24 }
 0x11e   :  { %227 = vtanh.f32 %v154_v25 }
 0x124   :  { %v228_v26 = vpop.eup %227 }
 0x125   :  { %214 = vmatmul.msk.f32.vlgmr.msra.gmra.mxu2 %vm132_vm1, %v228_v26 }
 0x1a8   :  { %v189_v28 = vpop.f32.mrf.mxu2 }
 0x1a9   :  { %v190_v29 = vadd.f32 %v224_v27, %v189_v28 }
 0x1ab   :  { %192 = vst [vmem:[#allocation10] sm:$0xff] %v190_v29 }
 0x1ac   :  { %203 = dma.vmem_to_hbm [thread:$0]  %s199_s25, 128, %s201_s28, [#allocation4]  }
 0x1ad   :  { %355 = dma.done.wait [#allocation4], 128  }
 0x1ae   :  { %356 = vsyncadd [#allocation4], 4294967168 }
 0x1af   :  { %208 = vsyncpa [#allocation3], 1 }
 0x1b0   :  { %209 = vsyncpa [#allocation6], 1 }
 0x1b1   :  { %210 = vsyncpa [#allocation9], 1 }
 0x1b2   :  { %211 = vsyncpa [#allocation4], 1 }

</bundles_post_ra>
